<compile_context>
chip_gen: v7x
topology: tpu7x:2x2x1
jax: 0.10.0
libtpu: 0.0.40
codegen_flags: <defaults>
</compile_context>

<pallas_src>
import functools
import math

import jax
import jax.numpy as jnp
from jax import lax
from jax.experimental import pallas as pl
from jax.experimental.pallas import tpu as pltpu

_NEG_INF = -1e30      # large finite negative: avoids NaN for fully-masked rows
_ROW_ALIGN = 16       # bf16 packs 2 rows/sublane -> keep slab slices tile-aligned


def _round_up(x, m):
    return (x + m - 1) // m * m


def _mha_kernel(q_ref, k_ref, v_ref, mask_ref, w_ref, o_ref, *,
                num_heads, pk, pv, e1, e2, e3, eout, offsets):
    """Grid = (B,). One grid step computes the full multi-head attention for
    one batch element; heads are a static unrolled loop over lane slices."""
    f32 = jnp.float32
    bf16 = jnp.bfloat16
    hpk = num_heads * pk
    hpv = num_heads * pv

    q = q_ref[0].astype(bf16)        # (S1, E1)
    k = k_ref[0].astype(bf16)        # (S2, E2)
    v = v_ref[0].astype(bf16)        # (S2, E3)

    # Additive mask bias built in-kernel from the int8 mask (pure VPU work,
    # hidden under the MXU; the int8 stream is 1/4 of an f32 bias stream).
    # mask==1 -> 0.0, mask==0 -> -1e30.
    bias = (mask_ref[0].astype(f32) - 1.0) * (-_NEG_INF)        # (S1, S2)

    # Unpack the head-stacked weights from the single pre-cast bf16 slab
    # (static, 16-row-aligned offsets -> cheap VMEM window loads).
    o_wq, o_bq, o_wk, o_bk, o_wv, o_bv, o_wo, o_bo = offsets
    wq = w_ref[o_wq:o_wq + e1, :hpk]          # (E1, H*Pk)
    bq = w_ref[o_bq:o_bq + 1, :hpk]           # (1,  H*Pk)
    wk = w_ref[o_wk:o_wk + e2, :hpk]          # (E2, H*Pk)
    bk = w_ref[o_bk:o_bk + 1, :hpk]
    wv = w_ref[o_wv:o_wv + e3, :hpv]          # (E3, H*Pv)
    bv = w_ref[o_bv:o_bv + 1, :hpv]
    wo = w_ref[o_wo:o_wo + hpv, :eout]        # (H*Pv, Eout)
    bo = w_ref[o_bo:o_bo + 1, :eout]

    scale = 1.0 / math.sqrt(pk)

    # Head-stacked projections: 3 MXU matmuls for all heads (was 3*H slivers).
    # bf16 operands, f32 accumulation; 1/sqrt(dk) folded into pq.
    pq = (jnp.dot(q, wq, preferred_element_type=f32) + bq.astype(f32)) * scale
    pkx = jnp.dot(k, wk, preferred_element_type=f32) + bk.astype(f32)
    pvx = jnp.dot(v, wv, preferred_element_type=f32) + bv.astype(f32)

    # Cast back to bf16 ONCE (hoisted); the head loop only slices lanes.
    pq_b = pq.astype(bf16)                    # (S1, H*Pk)
    pk_b = pkx.astype(bf16)                   # (S2, H*Pk)
    pv_b = pvx.astype(bf16)                   # (S2, H*Pv)

    head_outs = []
    for h in range(num_heads):                # static unroll
        ql = pq_b[:, h * pk:(h + 1) * pk]     # (S1, Pk)
        kl = pk_b[:, h * pk:(h + 1) * pk]     # (S2, Pk)
        vl = pv_b[:, h * pv:(h + 1) * pv]     # (S2, Pv)

        # Q K^T as a contraction over the last dims of both operands
        # (no explicit transpose -> no XLU transpose on the critical path).
        s = lax.dot_general(ql, kl,
                            dimension_numbers=(((1,), (1,)), ((), ())),
                            preferred_element_type=f32) + bias   # (S1, S2)

        # Numerically-stable softmax (f32); divide via EUP approx reciprocal.
        m = jnp.max(s, axis=-1, keepdims=True)
        e = jnp.exp(s - m)
        d = jnp.sum(e, axis=-1, keepdims=True)
        w = e * pl.reciprocal(d, approx=True)                    # (S1, S2)

        # TODO(synk): dropout on `w` skipped (eval semantics, dropout_p -> 0).

        head_outs.append(jnp.dot(w.astype(bf16), vl,
                                 preferred_element_type=f32))    # (S1, Pv)

    # Concat heads at static lane offsets, then ONE output projection
    # (replaces H sliver matmuls + the serial accumulate chain).
    concat = jnp.concatenate(head_outs, axis=-1).astype(bf16)    # (S1, H*Pv)
    out = jnp.dot(concat, wo, preferred_element_type=f32) + bo.astype(f32)
    o_ref[0] = out.astype(o_ref.dtype)


def _pack_params(params):
    """Fuse per-head weights into head-stacked layouts, pre-cast to bf16, and
    pack everything into ONE 2-D slab (single DMA descriptor).

    Returns (slab, offsets, dims)."""
    H, E1, Pk = params["wq"].shape
    E2 = params["wk"].shape[1]
    E3, Pv = params["wv"].shape[1], params["wv"].shape[2]
    Eout = params["wo"].shape[2]
    hpk, hpv = H * Pk, H * Pv
    width = max(hpk, hpv, Eout)

    # Head-stacked (fused) layouts; head-major along the stacked dimension so
    # that concat(head_outputs) @ wo_flat is identical to the per-head sum.
    wq_f = jnp.transpose(params["wq"], (1, 0, 2)).reshape(E1, hpk)
    bq_f = params["bq"].reshape(1, hpk)
    wk_f = jnp.transpose(params["wk"], (1, 0, 2)).reshape(E2, hpk)
    bk_f = params["bk"].reshape(1, hpk)
    wv_f = jnp.transpose(params["wv"], (1, 0, 2)).reshape(E3, hpv)
    bv_f = params["bv"].reshape(1, hpv)
    wo_f = params["wo"].reshape(hpv, Eout)
    bo_f = params["bo"].reshape(1, Eout)

    pieces = [wq_f, bq_f, wk_f, bk_f, wv_f, bv_f, wo_f, bo_f]
    blocks, offsets, row = [], [], 0
    for p in pieces:
        offsets.append(row)
        r, c = p.shape
        rpad = _round_up(r, _ROW_ALIGN)
        blocks.append(jnp.pad(p, ((0, rpad - r), (0, width - c))))
        row += rpad
    slab = jnp.concatenate(blocks, axis=0).astype(jnp.bfloat16)

    dims = dict(num_heads=H, pk=Pk, pv=Pv, e1=E1, e2=E2, e3=E3, eout=Eout)
    return slab, tuple(offsets), dims


def multi_head_attention(query, key, value, attention_mask, params):
    """query: (B,S1,E1)  key: (B,S2,E2)  value: (B,S2,E3)
    attention_mask: (B,S1,S2) bool (True = keep, False = mask out)."""
    B, S1, E1 = query.shape
    _, S2, E2 = key.shape
    E3 = value.shape[-1]
    Eout = params["wo"].shape[-1]

    slab, offsets, dims = _pack_params(params)
    R, W = slab.shape

    # int8 mask: smallest reliable vector dtype to stream; bias built in-kernel.
    mask_i8 = attention_mask.astype(jnp.int8)

    kernel = functools.partial(_mha_kernel, offsets=offsets, **dims)

    grid_spec = pltpu.PrefetchScalarGridSpec(
        num_scalar_prefetch=0,
        grid=(B,),
        in_specs=[
            pl.BlockSpec((1, S1, E1), lambda b: (b, 0, 0)),      # query
            pl.BlockSpec((1, S2, E2), lambda b: (b, 0, 0)),      # key
            pl.BlockSpec((1, S2, E3), lambda b: (b, 0, 0)),      # value
            pl.BlockSpec((1, S1, S2), lambda b: (b, 0, 0)),      # int8 mask
            pl.BlockSpec((R, W), lambda b: (0, 0)),              # packed weights/biases
        ],
        out_specs=pl.BlockSpec((1, S1, Eout), lambda b: (b, 0, 0)),
    )

    return pl.pallas_call(
        kernel,
        out_shape=jax.ShapeDtypeStruct((B, S1, Eout), jnp.float32),
        grid_spec=grid_spec,
        # "parallel" lets dual-TC chips (v7x) shard the batch across cores;
        # on single-TC v5e/v6e the serial 2-step grid costs ~0.35 us total.
        compiler_params=pltpu.CompilerParams(
            dimension_semantics=("parallel",)),
    )(query, key, value, mask_i8, slab)


def reference(query, key, value, attention_mask, params):
    """Pure-JAX f32 reference mirroring the PyTorch module (eval mode)."""
    H, _, Pk = params["wq"].shape
    outs = []
    for h in range(H):
        pq = query @ params["wq"][h] + params["bq"][h, 0]
        pk = key @ params["wk"][h] + params["bk"][h, 0]
        pv = value @ params["wv"][h] + params["bv"][h, 0]
        scores = jnp.einsum("bsd,btd->bst", pq, pk) / math.sqrt(Pk)
        scores = jnp.where(attention_mask, scores, -jnp.inf)
        w = jax.nn.softmax(scores, axis=-1)
        outs.append(jnp.einsum("bst,btd->bsd", w, pv))
    concat = jnp.concatenate(outs, axis=-1)
    wo_flat = params["wo"].reshape(-1, params["wo"].shape[-1])   # (H*Pv, Eout)
    return concat @ wo_flat + params["bo"][0]


if __name__ == "__main__":
    # Module configuration (small, deterministic).
    B, S1, S2 = 2, 8, 16
    E1, E2, E3 = 16, 24, 32          # query / key / value embedding dims
    QK_PROJ, V_PROJ = 16, 32         # total projection dims
    H = 4
    Pk, Pv = QK_PROJ // H, V_PROJ // H
    Eout = V_PROJ

    key0 = jax.random.PRNGKey(0)
    ks = jax.random.split(key0, 12)

    query = jax.random.normal(ks[0], (B, S1, E1), jnp.float32)
    key_t = jax.random.normal(ks[1], (B, S2, E2), jnp.float32)
    value = jax.random.normal(ks[2], (B, S2, E3), jnp.float32)

    # Boolean mask (True = keep); ensure at least one unmasked key per query row.
    mask_bool = jax.random.uniform(ks[3], (B, S1, S2)) > 0.3
    mask_bool = mask_bool.at[..., 0].set(True)

    scale = 0.1
    params = {
        "wq": scale * jax.random.normal(ks[4], (H, E1, Pk), jnp.float32),
        "bq": scale * jax.random.normal(ks[5], (H, 1, Pk), jnp.float32),
        "wk": scale * jax.random.normal(ks[6], (H, E2, Pk), jnp.float32),
        "bk": scale * jax.random.normal(ks[7], (H, 1, Pk), jnp.float32),
        "wv": scale * jax.random.normal(ks[8], (H, E3, Pv), jnp.float32),
        "bv": scale * jax.random.normal(ks[9], (H, 1, Pv), jnp.float32),
        "wo": scale * jax.random.normal(ks[10], (H, Pv, Eout), jnp.float32),
        "bo": scale * jax.random.normal(ks[11], (1, Eout), jnp.float32),
    }

    out = multi_head_attention(query, key_t, value, mask_bool, params)
    out = jax.block_until_ready(out)

    ref = reference(query, key_t, value, mask_bool, params)
    assert out.shape == (B, S1, Eout), out.shape
    max_err = float(jnp.max(jnp.abs(out - ref)))
    # bf16 MXU operands/weights + approx reciprocal vs. a pure-f32 reference.
    assert jnp.allclose(out, ref, atol=2e-2, rtol=2e-2), max_err

    print("KERNEL_OK")
</pallas_src>

<mosaic_0001>
module attributes {stable_mosaic.version = 11 : i64} {
  func.func @_mha_kernel(%arg0: i32, %arg1: memref<1x8x16xf32, #tpu.memory_space<vmem>>, %arg2: memref<1x16x24xf32, #tpu.memory_space<vmem>>, %arg3: memref<1x16x32xf32, #tpu.memory_space<vmem>>, %arg4: memref<1x8x16xi8, #tpu.memory_space<vmem>>, %arg5: memref<176x32xbf16, #tpu.memory_space<vmem>>, %arg6: memref<1x8x32xf32, #tpu.memory_space<vmem>>) attributes {dimension_semantics = [#tpu.dimension_semantics<parallel>], iteration_bounds = array<i64: 2>, scalar_prefetch = 0 : i64, scratch_operands = 0 : i64, tpu.core_type = #tpu.core_type<tc>, window_params = [{transform_indices = @transform_0, window_bounds = array<i64: 1, 8, 16>}, {transform_indices = @transform_1, window_bounds = array<i64: 1, 16, 24>}, {transform_indices = @transform_2, window_bounds = array<i64: 1, 16, 32>}, {transform_indices = @transform_3, window_bounds = array<i64: 1, 8, 16>}, {pipeline_mode = #tpu.pipeline_mode<synchronous>, transform_indices = @transform_4, window_bounds = array<i64: 176, 32>}, {transform_indices = @transform_5, window_bounds = array<i64: 1, 8, 32>}]} {
    %c0 = arith.constant 0 : index
    %c0_0 = arith.constant 0 : index
    %c0_1 = arith.constant 0 : index
    %0 = vector.load %arg1[%c0, %c0_0, %c0_1] : memref<1x8x16xf32, #tpu.memory_space<vmem>>, vector<1x8x16xf32>
    %1 = vector.shape_cast %0 : vector<1x8x16xf32> to vector<8x16xf32>
    %2 = arith.truncf %1 : vector<8x16xf32> to vector<8x16xbf16>
    %c0_2 = arith.constant 0 : index
    %c0_3 = arith.constant 0 : index
    %c0_4 = arith.constant 0 : index
    %3 = vector.load %arg2[%c0_2, %c0_3, %c0_4] : memref<1x16x24xf32, #tpu.memory_space<vmem>>, vector<1x16x24xf32>
    %4 = vector.shape_cast %3 : vector<1x16x24xf32> to vector<16x24xf32>
    %5 = arith.truncf %4 : vector<16x24xf32> to vector<16x24xbf16>
    %c0_5 = arith.constant 0 : index
    %c0_6 = arith.constant 0 : index
    %c0_7 = arith.constant 0 : index
    %6 = vector.load %arg3[%c0_5, %c0_6, %c0_7] : memref<1x16x32xf32, #tpu.memory_space<vmem>>, vector<1x16x32xf32>
    %7 = vector.shape_cast %6 : vector<1x16x32xf32> to vector<16x32xf32>
    %8 = arith.truncf %7 : vector<16x32xf32> to vector<16x32xbf16>
    %c0_8 = arith.constant 0 : index
    %c0_9 = arith.constant 0 : index
    %c0_10 = arith.constant 0 : index
    %9 = vector.load %arg4[%c0_8, %c0_9, %c0_10] : memref<1x8x16xi8, #tpu.memory_space<vmem>>, vector<1x8x16xi8>
    %10 = vector.shape_cast %9 : vector<1x8x16xi8> to vector<8x16xi8>
    %11 = arith.sitofp %10 : vector<8x16xi8> to vector<8x16xf32>
    %cst = arith.constant 1.000000e+00 : f32
    %12 = vector.broadcast %cst : f32 to vector<8x16xf32>
    %13 = arith.subf %11, %12 : vector<8x16xf32>
    %cst_11 = arith.constant 1.000000e+30 : f32
    %14 = vector.broadcast %cst_11 : f32 to vector<8x16xf32>
    %15 = arith.mulf %13, %14 : vector<8x16xf32>
    %c0_12 = arith.constant 0 : index
    %c0_13 = arith.constant 0 : index
    %16 = vector.load %arg5[%c0_12, %c0_13] : memref<176x32xbf16, #tpu.memory_space<vmem>>, vector<16x16xbf16>
    %c16 = arith.constant 16 : index
    %c0_14 = arith.constant 0 : index
    %17 = vector.load %arg5[%c16, %c0_14] : memref<176x32xbf16, #tpu.memory_space<vmem>>, vector<1x16xbf16>
    %c32 = arith.constant 32 : index
    %c0_15 = arith.constant 0 : index
    %18 = vector.load %arg5[%c32, %c0_15] : memref<176x32xbf16, #tpu.memory_space<vmem>>, vector<24x16xbf16>
    %c64 = arith.constant 64 : index
    %c0_16 = arith.constant 0 : index
    %19 = vector.load %arg5[%c64, %c0_16] : memref<176x32xbf16, #tpu.memory_space<vmem>>, vector<1x16xbf16>
    %c80 = arith.constant 80 : index
    %c0_17 = arith.constant 0 : index
    %20 = vector.load %arg5[%c80, %c0_17] : memref<176x32xbf16, #tpu.memory_space<vmem>>, vector<32x32xbf16>
    %c112 = arith.constant 112 : index
    %c0_18 = arith.constant 0 : index
    %21 = vector.load %arg5[%c112, %c0_18] : memref<176x32xbf16, #tpu.memory_space<vmem>>, vector<1x32xbf16>
    %c128 = arith.constant 128 : index
    %c0_19 = arith.constant 0 : index
    %22 = vector.load %arg5[%c128, %c0_19] : memref<176x32xbf16, #tpu.memory_space<vmem>>, vector<32x32xbf16>
    %c160 = arith.constant 160 : index
    %c0_20 = arith.constant 0 : index
    %23 = vector.load %arg5[%c160, %c0_20] : memref<176x32xbf16, #tpu.memory_space<vmem>>, vector<1x32xbf16>
    %cst_21 = arith.constant dense<0.000000e+00> : vector<8x16xf32>
    %24 = tpu.matmul %2, %16, %cst_21 {dimension_numbers = #tpu.dot_dimension_numbers<[1], [0], [0], [1], [0, 0, 1, 1], [], []>} : vector<8x16xbf16>, vector<16x16xbf16>, vector<8x16xf32> -> vector<8x16xf32>
    %25 = arith.extf %17 : vector<1x16xbf16> to vector<1x16xf32>
    %26 = vector.broadcast %25 : vector<1x16xf32> to vector<8x16xf32>
    %27 = arith.addf %24, %26 : vector<8x16xf32>
    %cst_22 = arith.constant 5.000000e-01 : f32
    %28 = vector.broadcast %cst_22 : f32 to vector<8x16xf32>
    %29 = arith.mulf %27, %28 : vector<8x16xf32>
    %cst_23 = arith.constant dense<0.000000e+00> : vector<16x16xf32>
    %30 = tpu.matmul %5, %18, %cst_23 {dimension_numbers = #tpu.dot_dimension_numbers<[1], [0], [0], [1], [0, 0, 1, 1], [], []>} : vector<16x24xbf16>, vector<24x16xbf16>, vector<16x16xf32> -> vector<16x16xf32>
    %31 = arith.extf %19 : vector<1x16xbf16> to vector<1x16xf32>
    %32 = vector.broadcast %31 : vector<1x16xf32> to vector<16x16xf32>
    %33 = arith.addf %30, %32 : vector<16x16xf32>
    %cst_24 = arith.constant dense<0.000000e+00> : vector<16x32xf32>
    %34 = tpu.matmul %8, %20, %cst_24 {dimension_numbers = #tpu.dot_dimension_numbers<[1], [0], [0], [1], [0, 0, 1, 1], [], []>} : vector<16x32xbf16>, vector<32x32xbf16>, vector<16x32xf32> -> vector<16x32xf32>
    %35 = arith.extf %21 : vector<1x32xbf16> to vector<1x32xf32>
    %36 = vector.broadcast %35 : vector<1x32xf32> to vector<16x32xf32>
    %37 = arith.addf %34, %36 : vector<16x32xf32>
    %38 = arith.truncf %29 : vector<8x16xf32> to vector<8x16xbf16>
    %39 = arith.truncf %33 : vector<16x16xf32> to vector<16x16xbf16>
    %40 = arith.truncf %37 : vector<16x32xf32> to vector<16x32xbf16>
    %41 = vector.extract_strided_slice %38 {offsets = [0, 0], sizes = [8, 4], strides = [1, 1]} : vector<8x16xbf16> to vector<8x4xbf16>
    %42 = vector.extract_strided_slice %39 {offsets = [0, 0], sizes = [16, 4], strides = [1, 1]} : vector<16x16xbf16> to vector<16x4xbf16>
    %43 = vector.extract_strided_slice %40 {offsets = [0, 0], sizes = [16, 8], strides = [1, 1]} : vector<16x32xbf16> to vector<16x8xbf16>
    %cst_25 = arith.constant dense<0.000000e+00> : vector<8x16xf32>
    %44 = tpu.matmul %41, %42, %cst_25 {dimension_numbers = #tpu.dot_dimension_numbers<[1], [1], [0], [0], [0, 0, 1, 0], [], []>} : vector<8x4xbf16>, vector<16x4xbf16>, vector<8x16xf32> -> vector<8x16xf32>
    %45 = arith.addf %44, %15 : vector<8x16xf32>
    %cst_26 = arith.constant dense<0xFF800000> : vector<8xf32>
    %46 = vector.multi_reduction <maximumf>, %45, %cst_26 [1] : vector<8x16xf32> to vector<8xf32>
    %47 = vector.shape_cast %46 : vector<8xf32> to vector<8x1xf32>
    %48 = vector.broadcast %47 : vector<8x1xf32> to vector<8x16xf32>
    %49 = arith.subf %45, %48 : vector<8x16xf32>
    %50 = math.exp %49 : vector<8x16xf32>
    %cst_27 = arith.constant dense<0.000000e+00> : vector<8xf32>
    %51 = vector.multi_reduction <add>, %50, %cst_27 [1] : vector<8x16xf32> to vector<8xf32>
    %52 = vector.shape_cast %51 : vector<8xf32> to vector<8x1xf32>
    %53 = tpu.reciprocal %52 {approx = true} : vector<8x1xf32> -> vector<8x1xf32>
    %54 = vector.broadcast %53 : vector<8x1xf32> to vector<8x16xf32>
    %55 = arith.mulf %50, %54 : vector<8x16xf32>
    %56 = arith.truncf %55 : vector<8x16xf32> to vector<8x16xbf16>
    %cst_28 = arith.constant dense<0.000000e+00> : vector<8x8xf32>
    %57 = tpu.matmul %56, %43, %cst_28 {dimension_numbers = #tpu.dot_dimension_numbers<[1], [0], [0], [1], [0, 0, 1, 1], [], []>} : vector<8x16xbf16>, vector<16x8xbf16>, vector<8x8xf32> -> vector<8x8xf32>
    %58 = vector.extract_strided_slice %38 {offsets = [0, 4], sizes = [8, 4], strides = [1, 1]} : vector<8x16xbf16> to vector<8x4xbf16>
    %59 = vector.extract_strided_slice %39 {offsets = [0, 4], sizes = [16, 4], strides = [1, 1]} : vector<16x16xbf16> to vector<16x4xbf16>
    %60 = vector.extract_strided_slice %40 {offsets = [0, 8], sizes = [16, 8], strides = [1, 1]} : vector<16x32xbf16> to vector<16x8xbf16>
    %cst_29 = arith.constant dense<0.000000e+00> : vector<8x16xf32>
    %61 = tpu.matmul %58, %59, %cst_29 {dimension_numbers = #tpu.dot_dimension_numbers<[1], [1], [0], [0], [0, 0, 1, 0], [], []>} : vector<8x4xbf16>, vector<16x4xbf16>, vector<8x16xf32> -> vector<8x16xf32>
    %62 = arith.addf %61, %15 : vector<8x16xf32>
    %cst_30 = arith.constant dense<0xFF800000> : vector<8xf32>
    %63 = vector.multi_reduction <maximumf>, %62, %cst_30 [1] : vector<8x16xf32> to vector<8xf32>
    %64 = vector.shape_cast %63 : vector<8xf32> to vector<8x1xf32>
    %65 = vector.broadcast %64 : vector<8x1xf32> to vector<8x16xf32>
    %66 = arith.subf %62, %65 : vector<8x16xf32>
    %67 = math.exp %66 : vector<8x16xf32>
    %cst_31 = arith.constant dense<0.000000e+00> : vector<8xf32>
    %68 = vector.multi_reduction <add>, %67, %cst_31 [1] : vector<8x16xf32> to vector<8xf32>
    %69 = vector.shape_cast %68 : vector<8xf32> to vector<8x1xf32>
    %70 = tpu.reciprocal %69 {approx = true} : vector<8x1xf32> -> vector<8x1xf32>
    %71 = vector.broadcast %70 : vector<8x1xf32> to vector<8x16xf32>
    %72 = arith.mulf %67, %71 : vector<8x16xf32>
    %73 = arith.truncf %72 : vector<8x16xf32> to vector<8x16xbf16>
    %cst_32 = arith.constant dense<0.000000e+00> : vector<8x8xf32>
    %74 = tpu.matmul %73, %60, %cst_32 {dimension_numbers = #tpu.dot_dimension_numbers<[1], [0], [0], [1], [0, 0, 1, 1], [], []>} : vector<8x16xbf16>, vector<16x8xbf16>, vector<8x8xf32> -> vector<8x8xf32>
    %75 = vector.extract_strided_slice %38 {offsets = [0, 8], sizes = [8, 4], strides = [1, 1]} : vector<8x16xbf16> to vector<8x4xbf16>
    %76 = vector.extract_strided_slice %39 {offsets = [0, 8], sizes = [16, 4], strides = [1, 1]} : vector<16x16xbf16> to vector<16x4xbf16>
    %77 = vector.extract_strided_slice %40 {offsets = [0, 16], sizes = [16, 8], strides = [1, 1]} : vector<16x32xbf16> to vector<16x8xbf16>
    %cst_33 = arith.constant dense<0.000000e+00> : vector<8x16xf32>
    %78 = tpu.matmul %75, %76, %cst_33 {dimension_numbers = #tpu.dot_dimension_numbers<[1], [1], [0], [0], [0, 0, 1, 0], [], []>} : vector<8x4xbf16>, vector<16x4xbf16>, vector<8x16xf32> -> vector<8x16xf32>
    %79 = arith.addf %78, %15 : vector<8x16xf32>
    %cst_34 = arith.constant dense<0xFF800000> : vector<8xf32>
    %80 = vector.multi_reduction <maximumf>, %79, %cst_34 [1] : vector<8x16xf32> to vector<8xf32>
    %81 = vector.shape_cast %80 : vector<8xf32> to vector<8x1xf32>
    %82 = vector.broadcast %81 : vector<8x1xf32> to vector<8x16xf32>
    %83 = arith.subf %79, %82 : vector<8x16xf32>
    %84 = math.exp %83 : vector<8x16xf32>
    %cst_35 = arith.constant dense<0.000000e+00> : vector<8xf32>
    %85 = vector.multi_reduction <add>, %84, %cst_35 [1] : vector<8x16xf32> to vector<8xf32>
    %86 = vector.shape_cast %85 : vector<8xf32> to vector<8x1xf32>
    %87 = tpu.reciprocal %86 {approx = true} : vector<8x1xf32> -> vector<8x1xf32>
    %88 = vector.broadcast %87 : vector<8x1xf32> to vector<8x16xf32>
    %89 = arith.mulf %84, %88 : vector<8x16xf32>
    %90 = arith.truncf %89 : vector<8x16xf32> to vector<8x16xbf16>
    %cst_36 = arith.constant dense<0.000000e+00> : vector<8x8xf32>
    %91 = tpu.matmul %90, %77, %cst_36 {dimension_numbers = #tpu.dot_dimension_numbers<[1], [0], [0], [1], [0, 0, 1, 1], [], []>} : vector<8x16xbf16>, vector<16x8xbf16>, vector<8x8xf32> -> vector<8x8xf32>
    %92 = vector.extract_strided_slice %38 {offsets = [0, 12], sizes = [8, 4], strides = [1, 1]} : vector<8x16xbf16> to vector<8x4xbf16>
    %93 = vector.extract_strided_slice %39 {offsets = [0, 12], sizes = [16, 4], strides = [1, 1]} : vector<16x16xbf16> to vector<16x4xbf16>
    %94 = vector.extract_strided_slice %40 {offsets = [0, 24], sizes = [16, 8], strides = [1, 1]} : vector<16x32xbf16> to vector<16x8xbf16>
    %cst_37 = arith.constant dense<0.000000e+00> : vector<8x16xf32>
    %95 = tpu.matmul %92, %93, %cst_37 {dimension_numbers = #tpu.dot_dimension_numbers<[1], [1], [0], [0], [0, 0, 1, 0], [], []>} : vector<8x4xbf16>, vector<16x4xbf16>, vector<8x16xf32> -> vector<8x16xf32>
    %96 = arith.addf %95, %15 : vector<8x16xf32>
    %cst_38 = arith.constant dense<0xFF800000> : vector<8xf32>
    %97 = vector.multi_reduction <maximumf>, %96, %cst_38 [1] : vector<8x16xf32> to vector<8xf32>
    %98 = vector.shape_cast %97 : vector<8xf32> to vector<8x1xf32>
    %99 = vector.broadcast %98 : vector<8x1xf32> to vector<8x16xf32>
    %100 = arith.subf %96, %99 : vector<8x16xf32>
    %101 = math.exp %100 : vector<8x16xf32>
    %cst_39 = arith.constant dense<0.000000e+00> : vector<8xf32>
    %102 = vector.multi_reduction <add>, %101, %cst_39 [1] : vector<8x16xf32> to vector<8xf32>
    %103 = vector.shape_cast %102 : vector<8xf32> to vector<8x1xf32>
    %104 = tpu.reciprocal %103 {approx = true} : vector<8x1xf32> -> vector<8x1xf32>
    %105 = vector.broadcast %104 : vector<8x1xf32> to vector<8x16xf32>
    %106 = arith.mulf %101, %105 : vector<8x16xf32>
    %107 = arith.truncf %106 : vector<8x16xf32> to vector<8x16xbf16>
    %cst_40 = arith.constant dense<0.000000e+00> : vector<8x8xf32>
    %108 = tpu.matmul %107, %94, %cst_40 {dimension_numbers = #tpu.dot_dimension_numbers<[1], [0], [0], [1], [0, 0, 1, 1], [], []>} : vector<8x16xbf16>, vector<16x8xbf16>, vector<8x8xf32> -> vector<8x8xf32>
    %109 = tpu.concatenate %57, %74, %91, %108 in 1 : vector<8x8xf32>, vector<8x8xf32>, vector<8x8xf32>, vector<8x8xf32> -> vector<8x32xf32>
    %110 = arith.truncf %109 : vector<8x32xf32> to vector<8x32xbf16>
    %cst_41 = arith.constant dense<0.000000e+00> : vector<8x32xf32>
    %111 = tpu.matmul %110, %22, %cst_41 {dimension_numbers = #tpu.dot_dimension_numbers<[1], [0], [0], [1], [0, 0, 1, 1], [], []>} : vector<8x32xbf16>, vector<32x32xbf16>, vector<8x32xf32> -> vector<8x32xf32>
    %112 = arith.extf %23 : vector<1x32xbf16> to vector<1x32xf32>
    %113 = vector.broadcast %112 : vector<1x32xf32> to vector<8x32xf32>
    %114 = arith.addf %111, %113 : vector<8x32xf32>
    %c0_42 = arith.constant 0 : index
    %c0_43 = arith.constant 0 : index
    %c0_44 = arith.constant 0 : index
    %115 = vector.load %arg6[%c0_42, %c0_43, %c0_44] : memref<1x8x32xf32, #tpu.memory_space<vmem>>, vector<1x8x32xf32>
    %116 = vector.shape_cast %115 : vector<1x8x32xf32> to vector<8x32xf32>
    %117 = vector.shape_cast %114 : vector<8x32xf32> to vector<1x8x32xf32>
    tpu.vector_store %arg6[%c0_42, %c0_43, %c0_44], %117 {strides = array<i32>} : memref<1x8x32xf32, #tpu.memory_space<vmem>>, vector<1x8x32xf32>,
    return
  }
  func.func @transform_0(%arg0: i32) -> (i32, i32, i32) {
    %c0_i32 = arith.constant 0 : i32
    %c0_i32_0 = arith.constant 0 : i32
    %c0_i32_1 = arith.constant 0 : i32
    return %arg0, %c0_i32, %c0_i32_0 : i32, i32, i32
  }
  func.func @transform_1(%arg0: i32) -> (i32, i32, i32) {
    %c0_i32 = arith.constant 0 : i32
    %c0_i32_0 = arith.constant 0 : i32
    %c0_i32_1 = arith.constant 0 : i32
    return %arg0, %c0_i32, %c0_i32_0 : i32, i32, i32
  }
  func.func @transform_2(%arg0: i32) -> (i32, i32, i32) {
    %c0_i32 = arith.constant 0 : i32
    %c0_i32_0 = arith.constant 0 : i32
    %c0_i32_1 = arith.constant 0 : i32
    return %arg0, %c0_i32, %c0_i32_0 : i32, i32, i32
  }
  func.func @transform_3(%arg0: i32) -> (i32, i32, i32) {
    %c0_i32 = arith.constant 0 : i32
    %c0_i32_0 = arith.constant 0 : i32
    %c0_i32_1 = arith.constant 0 : i32
    return %arg0, %c0_i32, %c0_i32_0 : i32, i32, i32
  }
  func.func @transform_4(%arg0: i32) -> (i32, i32) {
    %c0_i32 = arith.constant 0 : i32
    %c0_i32_0 = arith.constant 0 : i32
    %c0_i32_1 = arith.constant 0 : i32
    return %c0_i32, %c0_i32_0 : i32, i32
  }
  func.func @transform_5(%arg0: i32) -> (i32, i32, i32) {
    %c0_i32 = arith.constant 0 : i32
    %c0_i32_0 = arith.constant 0 : i32
    %c0_i32_1 = arith.constant 0 : i32
    return %arg0, %c0_i32, %c0_i32_0 : i32, i32, i32
  }
}

</mosaic_0001>

<bundles_post_ra>
// kernel: tpu_custom_call.1
= control target key start
LH: loop header
LB: loop body
LE: loop exit
PB: predicated region body
PF: predicated region fallthrough
CT: control target
= control target key end

     0   :  { %10 = vsyncpa [#allocation3], 0  ;;  %s1653_s0 = inlined_call_operand.vmem [shape: f32[2,8,16], index: 0, kind: input, shape index: {}]   ;;  %s1654_s1 = inlined_call_operand.vmem [shape: f32[2,16,24], index: 1, kind: input, shape index: {}]   ;;  %s1655_s2 = inlined_call_operand.vmem [shape: f32[2,16,32], index: 2, kind: input, shape index: {}]   ;;  %s1656_s3 = inlined_call_operand.vmem [shape: s8[2,8,16], index: 3, kind: input, shape index: {}]   ;;  %s1657_s4 = inlined_call_operand.vmem [shape: bf16[176,32], index: 4, kind: input, shape index: {}]   ;;  %s1658_s5 = inlined_call_operand.hbm [shape: f32[2,8,32], index: 5, kind: output, shape index: {}]  }
   0x1   :  { %12 = vsyncpa [#allocation3 + $0x1], 0  ;;  %s1427_s18 = smov 0   ;;  %s1429_s19 = smov 0  }
   0x2   :  { %s1431_s20 = smov 0   ;;  %s1433_s21 = smov 0  }
   0x3 LB: > { %s1448_s22 = sadd.s32 4294967295, %s1384_s21   ;;  %s1108_s23 = sadd.s32 4294967294, %s1384_s21   ;;  %s1384_s21 = sphi %s1433_s21, %s1664_s21   ;;  %s1380_s20 = sphi %s1431_s20, %s1663_s20   ;;  %s1376_s19 = sphi %s1429_s19, %s1662_s19   ;;  %s1372_s18 = sphi %s1427_s18, %s1661_s18  }
   0x4   : > { %s1452_s24 = sadd.s32 1, %s1384_s21   ;;  %s150_s25 = sadd.s32 1, %s1380_s20 }
   0x5   : > { %s147_s26 = ssub.s32 %s1384_s21, %s1452_s24  ;;  %p160_p0 = scmp.ne.s32.totalorder %s1380_s20, %s1376_s19 }
   0x6   : > { %p148_p1 = scmp.eq.s32.totalorder %s147_s26, 0  ;;  %p161_p2 = scmp.eq.s32.totalorder %s1448_s22, 1 }
   0x7   : > { %p166_p3 = scmp.ne.s32.totalorder %s1376_s19, %s1372_s18  ;;  %p167_p4 = scmp.eq.s32.totalorder %s1108_s23, 1 }
   0x8   : > { %s1463_s27 = scalar_select %p148_p1, %s1380_s20, %s150_s25  }
   0x9   : > { %p1465_p5 = por %p161_p2, %p160_p0  ;;  %p1469_p6 = por %p167_p4, %p166_p3 }
   0xa   : > { %p1111_p7 = scmp.ge.s32.totalorder %s1384_s21, 1  ;;  %p218_p8 = scmp.lt.s32.totalorder %s1384_s21, 3 }
   0xc   : > { %p219_p9 = pnand %p1111_p7, %p218_p8 }
   0xd   : > { %v1299_v0 = vld [vmem:[%s1657_s4 + $0x10] sm:$0xff] (!%p219_p9)   ;;  %v1386_v1 = vmov (!%p219_p9), 0.0   ;;  %v1300_v2 = vld [vmem:[%s1657_s4 + $0x18] ss:$0 sps:$4 sm:$0xff] (!%p219_p9)   ;;  %vm382_vm0 = vcmask (!%p219_p9), 1043456   ;;  %vm1387_vm1 = vmmov (!%p219_p9), 0   ;;  %v309_v10 = vlaneseq (!%p219_p9) }
   0xe   : > { %222 = sbr.rel (%p219_p9) target bundleno = 1473 (0x5c1), region = 40  ;;  %1178 = vmatprep.subr.bf16.mxu1 (!%p219_p9), %v1386_v1  ;;  %1172 = vmatprep.subr.bf16.mxu0 (!%p219_p9), %v1386_v1  ;;  %p259_p10 = scmp.lt.s32.totalorder (!%p219_p9), %s1448_s22, 1  ;;  %v384_v3 = vsel (!%p219_p9), %vm382_vm0, %v1300_v2, 0  ;;  %v1301_v4 = vld [vmem:[%s1657_s4] sm:$0xff] (!%p219_p9)   ;;  %vm378_vm2 = vcmask (!%p219_p9), 195584   ;;  %vm319_vm3 = vcmask (!%p219_p9), 130048  }
   0xf   : > { %1179 = vmatpush3.bf16.msra.mxu1 (!%p219_p9), %v1299_v0  ;;  %1182 = vmatprep.mubr.msk.bf16.mxu1 (!%p219_p9), %vm1387_vm1, %v1386_v1  ;;  %v310_v11 = vshrl.u32 (!%p219_p9), %v309_v10, 7  ;;  %v293_v12 = vld [vmem:[%s1657_s4 + $0x8] sm:$0x1] (!%p219_p9)  ;;  %v297_v13 = vld [vmem:[%s1657_s4 + $0x20] sm:$0x1] (!%p219_p9)  ;;  %vm492_vm4 = vcmask (!%p219_p9), 31744  }
  0x10   : > { %1180 = vmatprep.subr.bf16.mxu1 (!%p219_p9), %v1386_v1  ;;  %1174 = vmatprep.mubr.msk.bf16.mxu0 (!%p219_p9), %vm1387_vm1, %v1386_v1  ;;  %v308_v14 = vunpack.c.l.bf16 (!%p219_p9), %v293_v12  ;;  %v364_v16 = vunpack.c.l.bf16 (!%p219_p9), %v297_v13  ;;  %s1388_s8 = smov (!%p219_p9), 120   ;;  %s1389_s9 = smov (!%p219_p9), 124   ;;  %v1302_v34 = vld [vmem:[%s1657_s4 + $0x28] sm:$0xff] (!%p219_p9)   ;;  %v1303_v37 = vld [vmem:[%s1657_s4 + $0x30] sm:$0xff] (!%p219_p9)   ;;  %vm444_vm5 = vcmask (!%p219_p9), 261120   ;;  %vm933_vm6 = vcmask (!%p219_p9), 64512  }
  0x11   : > { %1173 = vmatpush3.bf16.msra.mxu0 (!%p219_p9), %v1301_v4  ;;  %v1519_v15 = vsub.s32 (!%p219_p9), 0, %v310_v11  ;;  %s1390_s10 = smov (!%p219_p9), 116   ;;  %v302_v59 = vld [vmem:[%s1657_s4 + $0x38] sm:$0x1] (!%p219_p9)  ;;  %s1393_s14 = smov (!%p219_p9), 8  }
  0x12   : > { %1186 = vmatprep.subr.bf16.mxu0 (!%p219_p9), %v1386_v1  ;;  %v427_v60 = vunpack.c.l.bf16 (!%p219_p9), %v302_v59  ;;  %s1394_s17 = smov (!%p219_p9), 16   ;;  %s1395_s23 = smov (!%p219_p9), 24  }
  0x13   : > { %1181 = vmatpush3.bf16.msra.mxu1 (!%p219_p9), %v384_v3  ;;  %v312_v17 = vrot.slane (!%p219_p9), %v308_v14, %v1519_v15  ;;  %v368_v18 = vrot.slane (!%p219_p9), %v364_v16, %v1519_v15 }
  0x14   : > { %1194 = vmatprep.subr.bf16.mxu1 (!%p219_p9), %v1386_v1  ;;  %v431_v61 = vrot.slane (!%p219_p9), %v427_v60, %v1519_v15 }
  0x15   : > { %s1493_s11 = scalar_select %p259_p10, %s1448_s22, 1 }
  0x17   : > { %s1143_s12 = sshll.u32 %s1493_s11, 4  ;;  %s1113_s13 = sshll.u32 %s1493_s11, 3 }
  0x18   : > { %s267_s16 = scalar_lea.vmem %s1654_s1, %s1143_s12  ;;  %s262_s25 = scalar_lea.vmem %s1653_s0, %s1113_s13 }
  0x19   : > { %v280_v5 = vld [vmem:[%s267_s16] sm:$0xff]  ;;  %v281_v6 = vld [vmem:[%s267_s16 + $0x8] sm:$0xff]  ;;  %s272_s15 = scalar_lea.vmem %s1655_s2, %s1143_s12  ;;  %s1118_s12 = sshll.u32 %s1493_s11, 1 }
  0x1a   : > { %v282_v7 = vpack.c.bf16 %v281_v6, %v280_v5  ;;  %v278_v8 = vld [vmem:[%s262_s25] sm:$0xff]  ;;  %v284_v36 = vld [vmem:[%s272_s15 + $0x8] sm:$0xff]  ;;  %s276_s6 = scalar_lea.vmem %s1656_s3, %s1118_s12  ;;  %s1391_s11 = smov 104  }
  0x1b   : > { %v279_v9 = vpack.c.bf16 %v278_v8, %v278_v8  ;;  %v283_v35 = vld [vmem:[%s272_s15] sm:$0xff]  ;;  %s256_s25 = sand.u32 1, %s1376_s19  }
  0x1c   : > { %1183 = vmatmul.mubr.msk.bf16.vlgmr.msra.gmra.mrb[0].mxu1 %vm378_vm2, %v282_v7  ;;  %v285_v38 = vpack.c.bf16 %v284_v36, %v283_v35  ;;  %v286_v48 = vld [vmem:[%s276_s6] sm:$0x3]  ;;  %s1112_s30 = sshll.u32 %s256_s25, 3  ;;  %s1140_s6 = sshll.u32 %s1448_s22, 7 }
  0x1d   : > { %1175 = vmatmul.mubr.msk.bf16.vlgmr.msra.gmra.mrb[0].mxu0 %vm319_vm3, %v279_v9  ;;  %1196 = vmatprep.mubr.msk.bf16.mxu1 %vm1387_vm1, %v1386_v1  ;;  %v287_v49 = vunpack.c.0.s8 %v286_v48  ;;  %s258_s7 = scalar_lea.vmem [#allocation2], %s1112_s30  ;;  %s1000_s22 = scalar_lea.sflag [#allocation3], %s256_s25 }
  0x1e   : > { %1190 = vmatprep.mubr.msk.bf16.mxu0 %vm1387_vm1, %v1386_v1  ;;  %1187 = vmatpush3.bf16.msra.mxu0 %v1302_v34 }
  0x1f   : > { %1188 = vmatprep.subr.bf16.mxu0 %v1386_v1  ;;  %v288_v50 = vcvt.s32.f32 %v287_v49 }
  0x21   : > { %v1119_v51 = vadd.f32 -1.0, %v288_v50 }
  0x22   : > { %1189 = vmatpush3.bf16.msra.mxu0 %v1303_v37 }
  0x23   : > { %1200 = vmatprep.subr.bf16.mxu0 %v1386_v1  ;;  %v290_v52 = vmul.f32 1e+30, %v1119_v51 }
  0x25   : > { %1191 = vmatmul.mubr.msk.bf16.vlgmr.msra.gmra.mrb[4].mxu0 %vm444_vm5, %v285_v38 }
  0x26   : > { %1202 = vmatprep.mubr.msk.bf16.mxu0 %vm1387_vm1, %v1386_v1 }
  0xef   : > { %v420_v19 = vpop.f32.mrb[0].mxu1 }
  0xf0   : > { %v1184_v20 = vpop.f32.mrb[1].mxu1  ;;  %v357_v21 = vpop.f32.mrb[0].mxu0  ;;  %v421_v25 = vadd.f32 %v420_v19, %v368_v18 }
  0xf1   : > { %v423_v22 = vpop.f32.mrb[2].mxu1  ;;  %v358_v23 = vadd.f32 %v357_v21, %v312_v17  ;;  %v1176_v24 = vpop.f32.mrb[1].mxu0 }
  0xf2   : > { %v424_v26 = vadd.f32 %v423_v22, %v368_v18  ;;  %v1185_v27 = vpop.f32.mrb[3].mxu1  ;;  %v360_v28 = vpop.f32.mrb[2].mxu0 }
  0xf3   : > { %v363_v29 = vmul.f32 0.5, %v358_v23  ;;  %v1177_v30 = vpop.f32.mrb[3].mxu0 }
  0xf4   : > { %v490_v31 = vpack.c.bf16 %v424_v26, %v421_v25 }
  0xf5   : > { %v489_v32 = vpack.c.bf16 %v363_v29, %v363_v29 }
  0xf6   : > { %707 = vrot.lane.b32.xlu1 %v490_v31, %s1388_s8  ;;  %598 = vrot.lane.b32.xlu0 %v490_v31, %s1389_s9  ;;  %v497_v33 = vsel %vm492_vm4, %v490_v31, 0 }
  0xf7   : > { %1195 = vmatpush3.bf16.xpose.msra.mxu1 %v497_v33 }
  0xf8   : > { %1206 = vmatprep.subr.bf16.mxu1 %v1386_v1  ;;  %v482_v62 = vpop.f32.mrb[4].mxu0 }
  0xf9   : > { %v483_v63 = vadd.f32 %v482_v62, %v431_v61  ;;  %v1192_v0 = vpop.f32.mrb[5].mxu0 }
  0xfa   : > { %705 = vrot.lane.b32.xlu1 %v489_v32, %s1388_s8  ;;  %595 = vrot.lane.b32.xlu0 %v489_v32, %s1389_s9  ;;  %v485_v2 = vpop.f32.mrb[6].mxu0  ;;  %s1013_s9 = sshll.u32 %s258_s7, 4  ;;  %s1612_s9 = int_to_ptr.vmem [resolvable:$true] %s1013_s9 }
  0xfb   : > { %v486_v3 = vadd.f32 %v485_v2, %v431_v61  ;;  %v1193_v4 = vpop.f32.mrb[7].mxu0  ;;  %s1322_s13 = scalar_lea.vmem %s1612_s9, 128 }
  0xfc   : > { %p1323_p11 = scmp.ne.s32.totalorder %s1612_s9, %s1322_s13 }
  0xfd   : > { %v491_v5 = vpack.c.bf16 %v486_v3, %v483_v63 }
  0xfe   : > { %813 = vrot.lane.b32.xlu1 %v489_v32, %s1390_s10  ;;  %815 = vrot.lane.b32.xlu0 %v490_v31, %s1390_s10  ;;  %s1610_s10 = scalar_lea.hbm %s1658_s5, %s1140_s6  ;;  %p1324_p12 = pnand %p1323_p11, %p1465_p5 }
  0xff   : > { %1197 = vmatmul.mubr.msk.bf16.vlgmr.msra.gmra.mrb[4].mxu1 %vm492_vm4, %v489_v32  ;;  %1201 = vmatpush3.bf16.msra.mxu0 %v491_v5 }
 0x100   : > { %1208 = vmatprep.mubr.msk.bf16.mxu1 %vm1387_vm1, %v1386_v1  ;;  %1212 = vmatprep.subr.bf16.mxu0 %v1386_v1  ;;  %p1325_p13 = pneg %p1324_p12 }
 0x168   : > { %v599_v39 = vpop.permute.xlu0 %598  ;;  %v708_v41 = vpop.permute.xlu1 %707 }
 0x169   : > { %v604_v40 = vsel %vm492_vm4, %v599_v39, 0  ;;  %v713_v43 = vsel %vm492_vm4, %v708_v41, 0 }
 0x16a   : > { %1207 = vmatpush3.bf16.xpose.msra.mxu1 %v604_v40 }
 0x16b   : > { %1218 = vmatprep.subr.bf16.mxu1 %v1386_v1 }
 0x16c   : > { %v596_v42 = vpop.permute.xlu0 %595  ;;  %v706_v45 = vpop.permute.xlu1 %705 }
 0x170   : > { %v816_v44 = vpop.permute.xlu0 %815  ;;  %v814_v47 = vpop.permute.xlu1 %813 }
 0x171   : > { %1209 = vmatmul.mubr.msk.bf16.vlgmr.msra.gmra.mrb[8].mxu1 %vm492_vm4, %v596_v42  ;;  %v821_v46 = vsel %vm492_vm4, %v816_v44, 0 }
 0x172   : > { %1219 = vmatpush3.bf16.xpose.msra.mxu1 %v713_v43  ;;  %1220 = vmatprep.mubr.msk.bf16.mxu1 %vm1387_vm1, %v1386_v1 }
 0x173   : > { %1230 = vmatprep.subr.bf16.mxu1 %v1386_v1 }
 0x179   : > { %1221 = vmatmul.mubr.msk.bf16.vlgmr.msra.gmra.mrb[12].mxu1 %vm492_vm4, %v706_v45 }
 0x17a   : > { %1231 = vmatpush3.bf16.xpose.msra.mxu1 %v821_v46  ;;  %1232 = vmatprep.mubr.msk.bf16.mxu1 %vm1387_vm1, %v1386_v1 }
 0x17b   : > { %1242 = vmatprep.subr.bf16.mxu1 %v1386_v1 }
 0x181   : > { %1233 = vmatmul.mubr.msk.bf16.vlgmr.msra.gmra.mrb[16].mxu1 %vm492_vm4, %v814_v47 }
 0x182   : > { %1246 = vmatprep.mubr.msk.bf16.mxu1 %vm1387_vm1, %v1386_v1 }
 0x1d2   : > { %v533_v53 = vpop.f32.mrb[4].mxu1 }
 0x1d3   : > { %v534_v54 = vadd.f32 %v533_v53, %v290_v52  ;;  %v1198_v55 = vpop.f32.mrb[5].mxu1 }
 0x1d4   : > { %v536_v56 = vpop.f32.mrb[6].mxu1 }
 0x1d5   : > { %v1199_v57 = vpop.f32.mrb[7].mxu1  ;;  %v539_v58 = vsel %vm319_vm3, %v534_v54, -inf }
 0x1d6   : > { %540 = vmax.xlane.f32.xlu0 %v539_v58 }
 0x244   : > { %v640_v6 = vpop.f32.mrb[8].mxu1 }
 0x245   : > { %v641_v7 = vadd.f32 %v640_v6, %v290_v52  ;;  %v1210_v8 = vpop.f32.mrb[9].mxu1 }
 0x246   : > { %v643_v9 = vpop.f32.mrb[10].mxu1 }
 0x247   : > { %v1211_v10 = vpop.f32.mrb[11].mxu1  ;;  %v646_v11 = vsel %vm319_vm3, %v641_v7, -inf }
 0x248   : > { %647 = vmax.xlane.f32.xlu1 %v646_v11  ;;  %v1305_v10 = vld [vmem:[%s1657_s4 + $0x48] sm:$0xff]  }
 0x24c   : > { %v749_v12 = vpop.f32.mrb[12].mxu1 }
 0x24d   : > { %v750_v13 = vadd.f32 %v749_v12, %v290_v52  ;;  %v1222_v14 = vpop.f32.mrb[13].mxu1 }
 0x24e   : > { %v752_v16 = vpop.f32.mrb[14].mxu1 }
 0x24f   : > { %v1223_v17 = vpop.f32.mrb[15].mxu1  ;;  %v755_v18 = vsel %vm319_vm3, %v750_v13, -inf }
 0x250   : > { %756 = vmax.xlane.f32.xlu0 %v755_v18 }
 0x254   : > { %v857_v19 = vpop.f32.mrb[16].mxu1 }
 0x255   : > { %v858_v20 = vadd.f32 %v857_v19, %v290_v52  ;;  %v1234_v21 = vpop.f32.mrb[17].mxu1 }
 0x256   : > { %v860_v22 = vpop.f32.mrb[18].mxu1 }
 0x257   : > { %v1235_v23 = vpop.f32.mrb[19].mxu1  ;;  %v863_v24 = vsel %vm319_vm3, %v858_v20, -inf }
 0x258   : > { %864 = vmax.xlane.f32.xlu0 %v863_v24 }
 0x263   : > { %v541_v25 = vpop.xlane.xlu0 %540 }
 0x264   : > { %v542_v26 = vsub.f32 %v534_v54, %v541_v25 }
 0x266   : > { %v543_v27 = vmul.f32 1.442695, %v542_v26  ;;  %v307_v26 = vld [vmem:[%s1657_s4 + $0x50] sm:$0x1] }
 0x268   : > { %1306 = vpow2.f32 %v543_v27  ;;  %v938_v27 = vunpack.c.l.bf16 %v307_v26 }
 0x272   : > { %v1307_v28 = vpop.eup %1306 }
 0x273   : > { %v545_v29 = vsel %vm319_vm3, %v1307_v28, 0.0 }
 0x274   : > { %546 = vadd.xlane.f32.xlu1 %v545_v29 }
 0x285   : > { %659 = vrot.lane.b32.xlu1 %v491_v5, %s1388_s8  ;;  %s1392_s8 = smov 112  }
 0x2d5   : > { %v648_v30 = vpop.xlane.xlu1 %647 }
 0x2d6   : > { %v649_v31 = vsub.f32 %v641_v7, %v648_v30 }
 0x2d8   : > { %v650_v32 = vmul.f32 1.442695, %v649_v31 }
 0x2da   : > { %1308 = vpow2.f32 %v650_v32 }
 0x2dd   : > { %v757_v33 = vpop.xlane.xlu0 %756 }
 0x2de   : > { %v758_v34 = vsub.f32 %v750_v13, %v757_v33 }
 0x2e0   : > { %v759_v35 = vmul.f32 1.442695, %v758_v34 }
 0x2e2   : > { %1310 = vpow2.f32 %v759_v35 }
 0x2e4   : > { %v1309_v36 = vpop.eup %1308 }
 0x2e5   : > { %v865_v37 = vpop.xlane.xlu0 %864  ;;  %v652_v38 = vsel %vm319_vm3, %v1309_v36, 0.0 }
 0x2e6   : > { %v866_v39 = vsub.f32 %v858_v20, %v865_v37  ;;  %653 = vadd.xlane.f32.xlu0 %v652_v38 }
 0x2e8   : > { %v867_v40 = vmul.f32 1.442695, %v866_v39 }
 0x2ea   : > { %1312 = vpow2.f32 %v867_v40 }
 0x2ec   : > { %v1311_v41 = vpop.eup %1310 }
 0x2ed   : > { %v761_v42 = vsel %vm319_vm3, %v1311_v41, 0.0 }
 0x2ee   : > { %762 = vadd.xlane.f32.xlu1 %v761_v42 }
 0x2f4   : > { %v1313_v43 = vpop.eup %1312 }
 0x2f5   : > { %v869_v44 = vsel %vm319_vm3, %v1313_v43, 0.0 }
 0x2f6   : > { %870 = vadd.xlane.f32.xlu0 %v869_v44 }
 0x2ff   : > { %875 = vrot.lane.b32.xlu1 %v491_v5, %s1391_s11 }
 0x301   : > { %v547_v45 = vpop.xlane.xlu1 %546 }
 0x302   : > { %1314 = vrcp.f32 %v547_v45 }
 0x305   : > { %v660_v49 = vpop.permute.xlu1 %659 }
 0x30c   : > { %v1315_v46 = vpop.eup %1314  ;;  %767 = vrot.lane.b32.xlu0 %v491_v5, %s1392_s8  ;;  %v1304_v5 = vld [vmem:[%s1657_s4 + $0x40] sm:$0xff]  }
 0x30d   : > { %v549_v47 = vmul.f32 %v1315_v46, %v1307_v28  ;;  %1243 = vmatpush3.bf16.msra.mxu1 %v1304_v5  ;;  %v942_v28 = vrot.slane %v938_v27, %v1519_v15 }
 0x30e   : > { %1244 = vmatprep.subr.bf16.mxu1 %v1386_v1 }
 0x30f   : > { %v550_v48 = vpack.c.bf16 %v549_v47, %v549_v47 }
 0x311   : > { %1203 = vmatmul.mubr.msk.bf16.vlgmr.msra.gmra.mrb[8].mxu0 %vm319_vm3, %v550_v48  ;;  %1245 = vmatpush3.bf16.msra.mxu1 %v1305_v10 }
 0x312   : > { %1213 = vmatpush3.bf16.msra.mxu0 %v660_v49  ;;  %1214 = vmatprep.mubr.msk.bf16.mxu0 %vm1387_vm1, %v1386_v1 }
 0x313   : > { %1224 = vmatprep.subr.bf16.mxu0 %v1386_v1 }
 0x373   : > { %v654_v50 = vpop.xlane.xlu0 %653 }
 0x374   : > { %1316 = vrcp.f32 %v654_v50 }
 0x37b   : > { %v763_v51 = vpop.xlane.xlu1 %762 }
 0x37c   : > { %1318 = vrcp.f32 %v763_v51 }
 0x37e   : > { %v1317_v52 = vpop.eup %1316 }
 0x37f   : > { %v656_v53 = vmul.f32 %v1317_v52, %v1309_v36  ;;  %v876_v60 = vpop.permute.xlu1 %875 }
 0x381   : > { %v657_v54 = vpack.c.bf16 %v656_v53, %v656_v53 }
 0x383   : > { %v871_v55 = vpop.xlane.xlu0 %870  ;;  %1215 = vmatmul.mubr.msk.bf16.vlgmr.msra.gmra.mrb[12].mxu0 %vm319_vm3, %v657_v54 }
 0x384   : > { %1320 = vrcp.f32 %v871_v55  ;;  %1226 = vmatprep.mubr.msk.bf16.mxu0 %vm1387_vm1, %v1386_v1 }
 0x386   : > { %v1319_v56 = vpop.eup %1318 }
 0x387   : > { %v765_v57 = vmul.f32 %v1319_v56, %v1311_v41  ;;  %v768_v58 = vpop.permute.xlu0 %767 }
 0x388   : > { %1225 = vmatpush3.bf16.msra.mxu0 %v768_v58 }
 0x389   : > { %v766_v59 = vpack.c.bf16 %v765_v57, %v765_v57  ;;  %1236 = vmatprep.subr.bf16.mxu0 %v1386_v1 }
 0x38b   : > { %1227 = vmatmul.mubr.msk.bf16.vlgmr.msra.gmra.mrb[16].mxu0 %vm319_vm3, %v766_v59 }
 0x38c   : > { %1237 = vmatpush3.bf16.msra.mxu0 %v876_v60  ;;  %1238 = vmatprep.mubr.msk.bf16.mxu0 %vm1387_vm1, %v1386_v1 }
 0x38e   : > { %v1321_v61 = vpop.eup %1320 }
 0x38f   : > { %v873_v62 = vmul.f32 %v1321_v61, %v1313_v43 }
 0x391   : > { %v874_v63 = vpack.c.bf16 %v873_v62, %v873_v62 }
 0x393   : > { %1239 = vmatmul.mubr.msk.bf16.vlgmr.msra.gmra.mrb[20].mxu0 %vm319_vm3, %v874_v63 }
 0x3e4   : > { %v588_v0 = vpop.f32.mrb[8].mxu0 }
 0x3e5   : > { %v1204_v2 = vpop.f32.mrb[9].mxu0 }
 0x3e6   : > { %v591_v3 = vpop.f32.mrb[10].mxu0 }
 0x3e7   : > { %v1205_v4 = vpop.f32.mrb[11].mxu0 }
 0x456   : > { %v699_v6 = vpop.f32.mrb[12].mxu0 }
 0x457   : > { %922 = vrot.lane.b32.xlu1 %v699_v6, %s1393_s14  ;;  %v1216_v7 = vpop.f32.mrb[13].mxu0  ;;  %s1396_s14 = smov [#allocation2]  }
 0x458   : > { %v702_v8 = vpop.f32.mrb[14].mxu0  ;;  %s1326_s15 = sshll.u32 %s1396_s14, 4  ;;  %s1327_s15 = int_to_ptr.vmem [resolvable:$false] %s1326_s15 }
 0x459   : > { %v1217_v9 = vpop.f32.mrb[15].mxu0  ;;  %s1328_s16 = scalar_lea.vmem %s1327_s15, 256  ;;  %p1329_p0 = scmp.lt.s32.totalorder %s1612_s9, %s1327_s15 }
 0x45a   : > { %p1330_p1 = scmp.lt.s32.totalorder %s1328_s16, %s1322_s13 }
 0x45c   : > { %p1331_p2 = por %p1330_p1, %p1329_p0 }
 0x45e   : > { %v807_v11 = vpop.f32.mrb[16].mxu0  ;;  %p1332_p3 = pnand %p1331_p2, %p1325_p13 }
 0x45f   : > { %926 = vrot.lane.b32.xlu0 %v807_v11, %s1394_s17  ;;  %v1228_v12 = vpop.f32.mrb[17].mxu0 }
 0x460   : > { %v810_v13 = vpop.f32.mrb[18].mxu0 }
 0x461   : > { %v1229_v14 = vpop.f32.mrb[19].mxu0 }
 0x466   : > { %v915_v16 = vpop.f32.mrb[20].mxu0 }
 0x467   : > { %930 = vrot.lane.b32.xlu1 %v915_v16, %s1395_s23  ;;  %v1240_v1 = vpop.f32.mrb[21].mxu0 }
 0x468   : > { %v918_v17 = vpop.f32.mrb[22].mxu0 }
 0x469   : > { %v1241_v18 = vpop.f32.mrb[23].mxu0 }
 0x4c9   : > { %v923_v19 = vpop.permute.xlu1 %922 }
 0x4ca   : > { %v934_v21 = vsel %vm933_vm6, %v588_v0, %v923_v19 }
 0x4d1   : > { %v927_v20 = vpop.permute.xlu0 %926 }
 0x4d2   : > { %v935_v22 = vsel %vm319_vm3, %v934_v21, %v927_v20 }
 0x4d9   : > { %v931_v23 = vpop.permute.xlu1 %930 }
 0x4da   : > { %v936_v24 = vsel %vm378_vm2, %v935_v22, %v931_v23 }
 0x4db   : > { %v937_v25 = vpack.c.bf16 %v936_v24, %v936_v24 }
 0x4dd   : > { %1247 = vmatmul.mubr.msk.bf16.vlgmr.msra.gmra.mrb[20].mxu1 %vm444_vm5, %v937_v25 }
 0x5b0   : > { %v992_v29 = vpop.f32.mrb[20].mxu1 }
 0x5b1   : > { %v993_v30 = vadd.f32 %v992_v29, %v942_v28  ;;  %v1248_v31 = vpop.f32.mrb[21].mxu1 }
 0x5b2   : > { %v995_v32 = vpop.f32.mrb[22].mxu1 }
 0x5b3   : > { %v1249_v33 = vpop.f32.mrb[23].mxu1  ;;  %998 = vst.msk [vmem:[%s258_s7] sm:$0xff] %vm444_vm5, %v993_v30 }
 0x5b4   : > { %1335 = shalt.err (!%p1332_p3)
}
 0x5b5   : > { %s1336_s17 = scalar_lea.hbm %s1610_s10, 128  ;;  %s1340_s12 = scalar_lea.hbm %s1658_s5, 256 }
 0x5b6   : > { %p1337_p4 = scmp.ne.s32.totalorder %s1610_s10, %s1336_s17  ;;  %p1341_p9 = scmp.lt.u32.totalorder %s1610_s10, %s1658_s5 }
 0x5b7   : > { %p1342_p10 = scmp.lt.u32.totalorder %s1340_s12, %s1336_s17  ;;  %p1344_p12 = scmp.lt.u32.totalorder %s1336_s17, %s1610_s10 }
 0x5b8   : > { %p1338_p7 = pnand %p1337_p4, %p1465_p5 }
 0x5b9   : > { %p1343_p11 = por %p1342_p10, %p1341_p9 }
 0x5ba   : > { %p1339_p8 = pneg %p1338_p7 }
 0x5bb   : > { %p1345_p13 = por %p1344_p12, %p1343_p11 }
 0x5bd   : > { %p1346_p0 = pnand %p1345_p13, %p1339_p8 }
 0x5bf   : > { %1349 = shalt.err (!%p1346_p0)
}
 0x5c0   : > { %1250 = dma.vmem_to_hbm [thread:$0]  (%p1465_p5), %s1612_s9, 128, %s1610_s10, %s1000_s22  }
 0x5c1 PF: > { %p1256_p1 = scmp.ge.s32.totalorder %s1384_s21, 2  ;;  %s1025_s6 = sand.u32 1, %s1372_s18  }
 0x5c2   : > { %s1026_s7 = scalar_lea.sflag [#allocation3], %s1025_s6 }
 0x5c3   : > { %p1253_p2 = pnand %p1256_p1, %p1469_p6 }
 0x5c5   : > { %1367 = dma.done.wait (!%p1253_p2), %s1026_s7, 128  }
 0x5c6   : > { %1369 = vsyncadd (!%p1253_p2), %s1026_s7, 4294967168  ;;  %p15_p3 = scmp.ge.s32.totalorder %s1452_s24, 4   ;;  %s1661_s18 = smov %s1376_s19 }
 0x5c7   : > { %s1662_s19 = smov %s1380_s20  ;;  %s1663_s20 = smov %s1463_s27 }
 0x5c8   : > { %s1664_s21 = smov %s1452_s24  ;;  %17 = sbr.rel (!%p15_p3) target bundleno = 3 (0x3), region = 84 }
 0x5cf   :  { %1031 = vsyncpa [#allocation3], 1 }
 0x5d0   :  { %1033 = vsyncpa [#allocation3 + $0x1], 1 }

</bundles_post_ra>
